<compile_context>
chip_gen: v7x
topology: tpu7x:2x2x1
jax: 0.10.0
libtpu: 0.0.40
codegen_flags: <defaults>
</compile_context>

<pallas_src>
import jax
import jax.numpy as jnp
from jax.experimental import pallas as pl
from jax.experimental.pallas import tpu as pltpu

BN_EPS = 1e-5
LANE = 128


# ----------------------------- Pallas kernels -----------------------------

def in_proj_kernel(x_ref, w_ref, b_ref, o_ref):
    """y = relu(x @ W' + b')   (fcs[0] + bns[0] folded + act); stores bf16."""
    y = jnp.dot(x_ref[...], w_ref[...],
                preferred_element_type=jnp.float32) + b_ref[...]
    o_ref[...] = jnp.maximum(y, 0.0).astype(o_ref.dtype)


def linear_kernel(x_ref, w_ref, b_ref, o_ref):
    """Classifier head: o = x @ W + b  (f32 logits out)."""
    y = jnp.dot(x_ref[...], w_ref[...],
                preferred_element_type=jnp.float32) + b_ref[...]
    o_ref[...] = y.astype(o_ref.dtype)


def gcn_layer_kernel(mask_ref, adj_ref, h_ref, w_ref, b_ref, res_ref,
                     o_ref, acc_ref):
    """One GraphConvLayer + folded-BN + ReLU + residual:
         o = relu((A_norm @ h) @ W' + b') + res
       Grid = (row tiles, K tiles); acc_ref accumulates A_norm @ h in f32.
    """
    i = pl.program_id(0)
    k = pl.program_id(1)

    @pl.when(k == 0)
    def _():
        acc_ref[...] = jnp.zeros_like(acc_ref)

    # Block-sparse skip: all-zero adjacency tiles contribute nothing.
    # TODO(synk): drive the K index_map from a compacted nonzero-tile list so
    # zero tiles are not even DMA'd from HBM (currently only compute is skipped).
    @pl.when(mask_ref[i, k] != 0)
    def _():
        acc_ref[...] += jnp.dot(adj_ref[...], h_ref[...],
                                preferred_element_type=jnp.float32)

    @pl.when(k == pl.num_programs(1) - 1)
    def _():
        agg = acc_ref[...].astype(jnp.bfloat16)
        y = jnp.dot(agg, w_ref[...],
                    preferred_element_type=jnp.float32) + b_ref[...]
        y = jnp.maximum(y, 0.0) + res_ref[...].astype(jnp.float32)
        o_ref[...] = y.astype(o_ref.dtype)


# ------------------------------- call wrappers -----------------------------

def _round_up(x, m):
    return ((x + m - 1) // m) * m


def _vmem_budget(tm, tk, hd):
    """Explicit scoped-VMEM budget for the tiled GCN kernel (with headroom),
    capped well under v7x's 64 MiB physical VMEM."""
    adj_buf = 2 * tm * tk * 2          # bf16 adjacency tile, double-buffered
    h_buf = 2 * tk * hd * 2            # bf16 feature tile, double-buffered
    w_res = hd * hd * 2 + hd * 4       # resident W' (bf16) + b' (f32)
    res_buf = 2 * tm * hd * 2          # bf16 residual tile
    out_buf = 2 * tm * hd * 2          # bf16 output tile
    acc = tm * hd * 4                  # f32 accumulator scratch
    est = adj_buf + h_buf + w_res + res_buf + out_buf + acc
    return int(min(max(2 * est, 8 << 20), 48 << 20))


def _row_tiled_linear(kernel, x, w, b, tm, vmem_bytes, out_dtype):
    """Row-tiled  o = f(x @ W + b); W/b are resident (constant index_map)."""
    n, c_in = x.shape
    h = w.shape[1]
    return pl.pallas_call(
        kernel,
        out_shape=jax.ShapeDtypeStruct((n, h), out_dtype),
        grid_spec=pltpu.PrefetchScalarGridSpec(
            num_scalar_prefetch=0,
            grid=(n // tm,),
            in_specs=[
                pl.BlockSpec((tm, c_in), lambda i: (i, 0)),
                pl.BlockSpec((c_in, h), lambda i: (0, 0)),
                pl.BlockSpec((1, h), lambda i: (0, 0)),
            ],
            out_specs=pl.BlockSpec((tm, h), lambda i: (i, 0)),
        ),
        compiler_params=pltpu.CompilerParams(
            dimension_semantics=("parallel",),
            vmem_limit_bytes=vmem_bytes,
        ),
    )(x, w, b)


def _gcn_layer(adj, h, w, b, res, tile_mask, tm, tk, vmem_bytes):
    n = adj.shape[0]
    hd = w.shape[1]
    return pl.pallas_call(
        gcn_layer_kernel,
        out_shape=jax.ShapeDtypeStruct((n, hd), jnp.bfloat16),
        grid_spec=pltpu.PrefetchScalarGridSpec(
            num_scalar_prefetch=1,                     # tile_mask -> SMEM
            grid=(n // tm, n // tk),
            in_specs=[
                pl.BlockSpec((tm, tk), lambda i, k, m: (i, k)),   # A tile
                pl.BlockSpec((tk, hd), lambda i, k, m: (k, 0)),   # h tile
                pl.BlockSpec((hd, hd), lambda i, k, m: (0, 0)),   # W' resident
                pl.BlockSpec((1, hd), lambda i, k, m: (0, 0)),    # b' resident
                pl.BlockSpec((tm, hd), lambda i, k, m: (i, 0)),   # residual
            ],
            out_specs=pl.BlockSpec((tm, hd), lambda i, k, m: (i, 0)),
            scratch_shapes=[pltpu.VMEM((tm, hd), jnp.float32)],
        ),
        compiler_params=pltpu.CompilerParams(
            dimension_semantics=("parallel", "arbitrary"),
            vmem_limit_bytes=vmem_bytes,
        ),
    )(tile_mask, adj, h, w, b, res)


# ------------------------------- JAX glue ---------------------------------

def build_norm_adj(edge_index, n_nodes):
    """Dense normalized adjacency exactly as the PyTorch code builds it:
       d = degree(col, N); value = 1/sqrt(d[col]) * 1/sqrt(d[row]);
       adj[col, row] = value  (so out[dst] aggregates from src)."""
    row, col = edge_index[0], edge_index[1]
    d = jnp.zeros((n_nodes,), jnp.float32).at[col].add(1.0)
    d_norm_in = jnp.sqrt(1.0 / d[col])
    d_norm_out = jnp.sqrt(1.0 / d[row])
    value = d_norm_in * d_norm_out
    value = jnp.nan_to_num(value, nan=0.0, posinf=0.0, neginf=0.0)
    adj = jnp.zeros((n_nodes, n_nodes), jnp.float32).at[col, row].add(value)
    return adj


def _block_mask(adj, tm, tk):
    """int32 (n//tm, n//tk) mask: 1 iff the adjacency tile has any nonzero."""
    n = adj.shape[0]
    nr, nk = n // tm, n // tk
    blk = adj.reshape(nr, tm, nk, tk)
    return (jnp.abs(blk).sum(axis=(1, 3)) > 0).astype(jnp.int32)


def _fold_bn(w, b, bn):
    """Fold eval-mode BatchNorm into the preceding Linear."""
    scale = bn["g"] * jax.lax.rsqrt(bn["var"] + BN_EPS)      # (1, C)
    return w * scale, (b - bn["mu"]) * scale + bn["beta"]


def _pad2(a, rows, cols):
    return jnp.pad(a, ((0, rows - a.shape[0]), (0, cols - a.shape[1])))


def init_params(key, in_channels, hidden, out_channels, num_layers):
    """Deterministic synthetic parameters (shapes match the torch module)."""
    def linear(k, fan_in, fan_out):
        k1, k2 = jax.random.split(k)
        bound = 1.0 / jnp.sqrt(fan_in)
        w = jax.random.uniform(k1, (fan_in, fan_out), jnp.float32,
                               -bound, bound)          # stored as (in, out)
        b = jax.random.uniform(k2, (1, fan_out), jnp.float32, -bound, bound)
        return w, b

    def bn(k, c):
        k1, k2, k3, k4 = jax.random.split(k, 4)
        return dict(
            g=1.0 + 0.1 * jax.random.normal(k1, (1, c), jnp.float32),
            beta=0.1 * jax.random.normal(k2, (1, c), jnp.float32),
            mu=0.1 * jax.random.normal(k3, (1, c), jnp.float32),
            var=jax.random.uniform(k4, (1, c), jnp.float32, 0.5, 1.5),
        )

    keys = jax.random.split(key, 3 + 3 * num_layers)
    p = {}
    p["fc_w"], p["fc_b"] = linear(keys[0], in_channels, hidden)
    p["bn0"] = bn(keys[1], hidden)
    p["convs"] = []
    for i in range(num_layers):
        w, b = linear(keys[2 + 2 * i], hidden, hidden)
        p["convs"].append(dict(w=w, b=b, bn=bn(keys[3 + 2 * i], hidden)))
    p["cls_w"], p["cls_b"] = linear(keys[2 + 2 * num_layers],
                                    hidden, out_channels)
    return p


def graphconv_forward(x, edge_index, params, *, tm=256, tk=256):
    n_real = x.shape[0]
    hidden = params["fc_w"].shape[1]
    out_c = params["cls_w"].shape[1]

    # Lane-dense padded dims (hidden and classifier outputs -> x128).
    h_pad = _round_up(hidden, LANE)
    out_pad = _round_up(out_c, LANE)
    n_pad = _round_up(_round_up(n_real, tm), tk)

    x_p = jnp.pad(x, ((0, n_pad - n_real), (0, 0)))          # f32 (n_pad, Cin)

    # Dense normalized adjacency (semantics of the torch reference).
    adj = build_norm_adj(edge_index, n_pad)
    tile_mask = _block_mask(adj, tm, tk)
    adj_bf16 = adj.astype(jnp.bfloat16)

    vmem = _vmem_budget(tm, tk, h_pad)

    # fcs[0] -> bns[0] (folded) -> relu.  dropout = identity (eval mode).
    w0, b0 = _fold_bn(params["fc_w"], params["fc_b"], params["bn0"])
    w0 = _pad2(w0, w0.shape[0], h_pad)
    b0 = _pad2(b0, 1, h_pad)
    h = _row_tiled_linear(in_proj_kernel, x_p, w0, b0, tm, vmem,
                          jnp.bfloat16)
    layer0 = h  # residual source (layer_ only ever holds the post-fc act)

    # GraphConvLayer stack: agg -> W' -> relu -> (+ residual), fused per layer.
    for conv in params["convs"]:
        wc, bc = _fold_bn(conv["w"], conv["b"], conv["bn"])
        wc = _pad2(wc, h_pad, h_pad).astype(jnp.bfloat16)
        bc = _pad2(bc, 1, h_pad)
        h = _gcn_layer(adj_bf16, h, wc, bc, layer0, tile_mask, tm, tk, vmem)

    # Classifier head (padded out dim, sliced after the kernel).
    wcl = _pad2(params["cls_w"], h_pad, out_pad).astype(jnp.bfloat16)
    bcl = _pad2(params["cls_b"], 1, out_pad)
    out = _row_tiled_linear(linear_kernel, h, wcl, bcl, tm, vmem,
                            jnp.float32)
    return out[:n_real, :out_c]


# --------------------------------- main ------------------------------------

if __name__ == "__main__":
    key = jax.random.PRNGKey(0)
    N, E = 512, 2048
    in_channels, hidden_channels, out_channels, num_layers = 16, 32, 4, 2

    kx, kr, kc, kp = jax.random.split(key, 4)
    x = jax.random.normal(kx, (N, in_channels), jnp.float32)
    row = jax.random.randint(kr, (E,), 0, N, dtype=jnp.int32)
    col = jax.random.randint(kc, (E,), 0, N, dtype=jnp.int32)
    edge_index = jnp.stack([row, col], axis=0)

    params = init_params(kp, in_channels, hidden_channels, out_channels,
                         num_layers)

    out = graphconv_forward(x, edge_index, params, tm=256, tk=256)
    jax.block_until_ready(out)
    assert out.shape == (N, out_channels)
    print("KERNEL_OK")
</pallas_src>

<mosaic_0001>
module attributes {stable_mosaic.version = 11 : i64} {
  func.func @in_proj_kernel(%arg0: i32, %arg1: memref<256x16xf32, #tpu.memory_space<vmem>>, %arg2: memref<16x128xf32, #tpu.memory_space<vmem>>, %arg3: memref<1x128xf32, #tpu.memory_space<vmem>>, %arg4: memref<256x128xbf16, #tpu.memory_space<vmem>>) attributes {dimension_semantics = [#tpu.dimension_semantics<parallel>], iteration_bounds = array<i64: 2>, scalar_prefetch = 0 : i64, scratch_operands = 0 : i64, tpu.core_type = #tpu.core_type<tc>, window_params = [{transform_indices = @transform_0, window_bounds = array<i64: 256, 16>}, {pipeline_mode = #tpu.pipeline_mode<synchronous>, transform_indices = @transform_1, window_bounds = array<i64: 16, 128>}, {pipeline_mode = #tpu.pipeline_mode<synchronous>, transform_indices = @transform_2, window_bounds = array<i64: 1, 128>}, {transform_indices = @transform_3, window_bounds = array<i64: 256, 128>}]} {
    %c0 = arith.constant 0 : index
    %c0_0 = arith.constant 0 : index
    %0 = vector.load %arg1[%c0, %c0_0] : memref<256x16xf32, #tpu.memory_space<vmem>>, vector<256x16xf32>
    %c0_1 = arith.constant 0 : index
    %c0_2 = arith.constant 0 : index
    %1 = vector.load %arg2[%c0_1, %c0_2] : memref<16x128xf32, #tpu.memory_space<vmem>>, vector<16x128xf32>
    %cst = arith.constant dense<0.000000e+00> : vector<256x128xf32>
    %2 = tpu.matmul %0, %1, %cst {dimension_numbers = #tpu.dot_dimension_numbers<[1], [0], [0], [1], [0, 0, 1, 1], [], []>} : vector<256x16xf32>, vector<16x128xf32>, vector<256x128xf32> -> vector<256x128xf32>
    %c0_3 = arith.constant 0 : index
    %c0_4 = arith.constant 0 : index
    %3 = vector.load %arg3[%c0_3, %c0_4] : memref<1x128xf32, #tpu.memory_space<vmem>>, vector<1x128xf32>
    %4 = vector.broadcast %3 : vector<1x128xf32> to vector<256x128xf32>
    %5 = arith.addf %2, %4 : vector<256x128xf32>
    %cst_5 = arith.constant 0.000000e+00 : f32
    %6 = vector.broadcast %cst_5 : f32 to vector<256x128xf32>
    %7 = arith.maximumf %5, %6 : vector<256x128xf32>
    %8 = arith.truncf %7 : vector<256x128xf32> to vector<256x128xbf16>
    %c0_6 = arith.constant 0 : index
    %c0_7 = arith.constant 0 : index
    %9 = vector.load %arg4[%c0_6, %c0_7] : memref<256x128xbf16, #tpu.memory_space<vmem>>, vector<256x128xbf16>
    tpu.vector_store %arg4[%c0_6, %c0_7], %8 {strides = array<i32>} : memref<256x128xbf16, #tpu.memory_space<vmem>>, vector<256x128xbf16>,
    return
  }
  func.func @transform_0(%arg0: i32) -> (i32, i32) {
    %c0_i32 = arith.constant 0 : i32
    %c0_i32_0 = arith.constant 0 : i32
    return %arg0, %c0_i32 : i32, i32
  }
  func.func @transform_1(%arg0: i32) -> (i32, i32) {
    %c0_i32 = arith.constant 0 : i32
    %c0_i32_0 = arith.constant 0 : i32
    %c0_i32_1 = arith.constant 0 : i32
    return %c0_i32, %c0_i32_0 : i32, i32
  }
  func.func @transform_2(%arg0: i32) -> (i32, i32) {
    %c0_i32 = arith.constant 0 : i32
    %c0_i32_0 = arith.constant 0 : i32
    %c0_i32_1 = arith.constant 0 : i32
    return %c0_i32, %c0_i32_0 : i32, i32
  }
  func.func @transform_3(%arg0: i32) -> (i32, i32) {
    %c0_i32 = arith.constant 0 : i32
    %c0_i32_0 = arith.constant 0 : i32
    return %arg0, %c0_i32 : i32, i32
  }
}

</mosaic_0001>

<bundles_post_ra>
// kernel: tpu_custom_call.1
= control target key start
LH: loop header
LB: loop body
LE: loop exit
PB: predicated region body
PF: predicated region fallthrough
CT: control target
= control target key end

     0   :  { %8 = vsyncpa [#allocation3], 0  ;;  %s1462_s0 = inlined_call_operand.vmem [shape: f32[512,16], index: 0, kind: input, shape index: {}]   ;;  %s1463_s1 = inlined_call_operand.vmem [shape: f32[16,128], index: 1, kind: input, shape index: {}]   ;;  %s1464_s2 = inlined_call_operand.vmem [shape: f32[1,128], index: 2, kind: input, shape index: {}]   ;;  %s1465_s3 = inlined_call_operand.hbm [shape: bf16[512,128], index: 3, kind: output, shape index: {}]  }
   0x1   :  { %10 = vsyncpa [#allocation3 + $0x1], 0  ;;  %s1228_s12 = smov 0   ;;  %s1230_s13 = smov 0  }
   0x2   :  { %s1232_s14 = smov 0   ;;  %s1234_s15 = smov 0  }
   0x3 LB: > { %s1249_s16 = sadd.s32 4294967295, %s1203_s15   ;;  %s803_s17 = sadd.s32 4294967294, %s1203_s15   ;;  %s1203_s15 = sphi %s1234_s15, %s1471_s15   ;;  %s1199_s14 = sphi %s1232_s14, %s1470_s14   ;;  %s1195_s13 = sphi %s1230_s13, %s1469_s13   ;;  %s1191_s12 = sphi %s1228_s12, %s1468_s12  }
   0x4   : > { %s1253_s18 = sadd.s32 1, %s1203_s15   ;;  %s91_s19 = sadd.s32 1, %s1199_s14 }
   0x5   : > { %s88_s20 = ssub.s32 %s1203_s15, %s1253_s18  ;;  %p101_p0 = scmp.ne.s32.totalorder %s1199_s14, %s1195_s13 }
   0x6   : > { %p89_p1 = scmp.eq.s32.totalorder %s88_s20, 0  ;;  %p102_p2 = scmp.eq.s32.totalorder %s1249_s16, 1 }
   0x7   : > { %p107_p3 = scmp.ne.s32.totalorder %s1195_s13, %s1191_s12  ;;  %p108_p4 = scmp.eq.s32.totalorder %s803_s17, 1 }
   0x8   : > { %s1264_s21 = scalar_select %p89_p1, %s1199_s14, %s91_s19  }
   0x9   : > { %p1266_p5 = por %p102_p2, %p101_p0  ;;  %p1270_p6 = por %p108_p4, %p107_p3 }
   0xa   : > { %p806_p7 = scmp.ge.s32.totalorder %s1203_s15, 1  ;;  %p141_p8 = scmp.lt.s32.totalorder %s1203_s15, 3 }
   0xc   : > { %p142_p9 = pnand %p806_p7, %p141_p8 }
   0xd   : > { %v204_v0 = vld [vmem:[%s1463_s1] sm:$0xff] (!%p142_p9)  ;;  %v205_v1 = vld [vmem:[%s1463_s1 + $0x8] sm:$0xff] (!%p142_p9)  ;;  %s808_s28 = sshll.u32 (!%p142_p9), %s1249_s16, 5  ;;  %vm213_vm0 = vcmask (!%p142_p9), 130048   ;;  %s162_s8 = sand.u32 (!%p142_p9), 1, %s1195_s13  }
   0xe   : > { %145 = sbr.rel (%p142_p9) target bundleno = 289 (0x121), region = 32  ;;  %v1094_v2 = vpack.c.bf16 (!%p142_p9), %v205_v1, %v204_v0  ;;  %p166_p10 = scmp.lt.s32.totalorder (!%p142_p9), %s808_s28, 63  ;;  %v1355_v35 = vld [vmem:[%s1464_s2] ss:$0 sm:$0xff] (!%p142_p9) }
   0xf   : > { %s807_s9 = sshll.u32 (!%p142_p9), %s162_s8, 7  ;;  %s912_s11 = sshll.u32 (!%p142_p9), %s1249_s16, 11 }
  0x10   : > { %1095 = vmatprep.subr.bf16.mxu0 (!%p142_p9), %v1094_v2  ;;  %1098 = vmatprep.subr.bf16.mxu1 (!%p142_p9), %v1094_v2  ;;  %s1368_s10 = scalar_lea.vmem (!%p142_p9), [#allocation2], %s807_s9  ;;  %s1413_s24 = scalar_lea.hbm (!%p142_p9), %s1465_s3, %s912_s11 }
  0x11   : > { %1097 = vmatpush3.bf16.msra.mxu0 (!%p142_p9), %v1094_v2  ;;  %1099 = vmatpush3.bf16.msra.mxu1 (!%p142_p9), %v1094_v2  ;;  %s741_s17 = sshll.u32 (!%p142_p9), %s1368_s10, 4  ;;  %s1421_s16 = scalar_lea.sflag (!%p142_p9), [#allocation3], %s162_s8  ;;  %s1415_s17 = int_to_ptr.vmem [resolvable:$true] %s741_s17 }
  0x12   : > { %s1141_s25 = scalar_lea.vmem (!%p142_p9), %s1415_s17, 2048  ;;  %s1205_s26 = smov (!%p142_p9), [#allocation2]  }
  0x13   : > { %p1142_p11 = scmp.ne.s32.totalorder (!%p142_p9), %s1415_s17, %s1141_s25  ;;  %s1145_s27 = sshll.u32 (!%p142_p9), %s1205_s26, 4  ;;  %s1146_s27 = int_to_ptr.vmem [resolvable:$false] %s1145_s27 }
  0x14   : > { %p1148_p0 = scmp.lt.s32.totalorder (!%p142_p9), %s1415_s17, %s1146_s27 }
  0x15   : > { %s1473_s28 = smov (!%p166_p10, %s808_s28), 63  ;;  %p1143_p12 = pnand %p1142_p11, %p1266_p5 }
  0x16   : > { %s809_s29 = sshll.u32 %s1473_s28, 3  ;;  %s1147_s28 = scalar_lea.vmem %s1146_s27, 4096 }
  0x17   : > { %s1286_s5 = scalar_lea.vmem %s1462_s0, %s809_s29  ;;  %p1144_p13 = pneg %p1143_p12 }
  0x18   : > { %v172_v3 = vld [vmem:[%s1286_s5] sm:$0xff]  ;;  %v173_v5 = vld [vmem:[%s1286_s5 + $0x8] sm:$0xff]  ;;  %v174_v7 = vld [vmem:[%s1286_s5 + $0x10] sm:$0xff]  ;;  %p1149_p1 = scmp.lt.s32.totalorder %s1147_s28, %s1141_s25 }
  0x19   : > { %v188_v4 = vld [vmem:[%s1286_s5 + $0x80] sm:$0xff]  ;;  %1046 = vmatprep.mubr.msk.f32.mxu0 %vm213_vm0, %v172_v3  ;;  %v189_v6 = vld [vmem:[%s1286_s5 + $0x88] sm:$0xff]  ;;  %v190_v8 = vld [vmem:[%s1286_s5 + $0x90] sm:$0xff] }
  0x1a   : > { %1070 = vmatprep.mubr.msk.f32.mxu1 %vm213_vm0, %v188_v4  ;;  %1047 = vmatmul.mubr.msk.f32.vlgmr.msra.gmra.mrb[0].mxu0 %vm213_vm0, %v173_v5  ;;  %v175_v9 = vld [vmem:[%s1286_s5 + $0x18] sm:$0xff]  ;;  %v176_v11 = vld [vmem:[%s1286_s5 + $0x20] sm:$0xff]  ;;  %v177_v13 = vld [vmem:[%s1286_s5 + $0x28] sm:$0xff]  ;;  %p1150_p2 = por %p1149_p1, %p1148_p0 }
  0x1b   : > { %1071 = vmatmul.mubr.msk.f32.vlgmr.msra.gmra.mrb[0].mxu1 %vm213_vm0, %v189_v6  ;;  %1049 = vmatprep.mubr.msk.f32.mxu0 %vm213_vm0, %v174_v7  ;;  %v191_v10 = vld [vmem:[%s1286_s5 + $0x98] sm:$0xff]  ;;  %v192_v12 = vld [vmem:[%s1286_s5 + $0xa0] sm:$0xff]  ;;  %v193_v14 = vld [vmem:[%s1286_s5 + $0xa8] sm:$0xff] }
  0x1c   : > { %1073 = vmatprep.mubr.msk.f32.mxu1 %vm213_vm0, %v190_v8  ;;  %v178_v15 = vld [vmem:[%s1286_s5 + $0x30] sm:$0xff]  ;;  %v179_v17 = vld [vmem:[%s1286_s5 + $0x38] sm:$0xff]  ;;  %v180_v19 = vld [vmem:[%s1286_s5 + $0x40] sm:$0xff]  ;;  %p1151_p3 = pnand %p1150_p2, %p1144_p13 }
  0x1d   : > { %v194_v16 = vld [vmem:[%s1286_s5 + $0xb0] sm:$0xff]  ;;  %v195_v18 = vld [vmem:[%s1286_s5 + $0xb8] sm:$0xff]  ;;  %v196_v20 = vld [vmem:[%s1286_s5 + $0xc0] sm:$0xff] }
  0x1e   : > { %1050 = vmatmul.mubr.msk.f32.gmra.mrb[2].mxu0 %vm213_vm0, %v175_v9  ;;  %v181_v21 = vld [vmem:[%s1286_s5 + $0x48] sm:$0xff]  ;;  %v182_v23 = vld [vmem:[%s1286_s5 + $0x50] sm:$0xff]  ;;  %v183_v25 = vld [vmem:[%s1286_s5 + $0x58] sm:$0xff] }
  0x1f   : > { %1074 = vmatmul.mubr.msk.f32.gmra.mrb[2].mxu1 %vm213_vm0, %v191_v10  ;;  %1052 = vmatprep.mubr.msk.f32.mxu0 %vm213_vm0, %v176_v11  ;;  %v197_v22 = vld [vmem:[%s1286_s5 + $0xc8] sm:$0xff]  ;;  %v198_v24 = vld [vmem:[%s1286_s5 + $0xd0] sm:$0xff]  ;;  %v199_v26 = vld [vmem:[%s1286_s5 + $0xd8] sm:$0xff] }
  0x20   : > { %1076 = vmatprep.mubr.msk.f32.mxu1 %vm213_vm0, %v192_v12  ;;  %v184_v27 = vld [vmem:[%s1286_s5 + $0x60] sm:$0xff]  ;;  %v185_v29 = vld [vmem:[%s1286_s5 + $0x68] sm:$0xff]  ;;  %v186_v31 = vld [vmem:[%s1286_s5 + $0x70] sm:$0xff] }
  0x21   : > { %v200_v28 = vld [vmem:[%s1286_s5 + $0xe0] sm:$0xff]  ;;  %v201_v30 = vld [vmem:[%s1286_s5 + $0xe8] sm:$0xff]  ;;  %v202_v32 = vld [vmem:[%s1286_s5 + $0xf0] sm:$0xff] }
  0x22   : > { %1053 = vmatmul.mubr.msk.f32.gmra.mrb[4].mxu0 %vm213_vm0, %v177_v13  ;;  %v187_v33 = vld [vmem:[%s1286_s5 + $0x78] sm:$0xff] }
  0x23   : > { %1077 = vmatmul.mubr.msk.f32.gmra.mrb[4].mxu1 %vm213_vm0, %v193_v14  ;;  %1055 = vmatprep.mubr.msk.f32.mxu0 %vm213_vm0, %v178_v15  ;;  %v203_v34 = vld [vmem:[%s1286_s5 + $0xf8] sm:$0xff] }
  0x24   : > { %1079 = vmatprep.mubr.msk.f32.mxu1 %vm213_vm0, %v194_v16 }
  0x26   : > { %1056 = vmatmul.mubr.msk.f32.gmra.mrb[6].mxu0 %vm213_vm0, %v179_v17 }
  0x27   : > { %1080 = vmatmul.mubr.msk.f32.gmra.mrb[6].mxu1 %vm213_vm0, %v195_v18  ;;  %1058 = vmatprep.mubr.msk.f32.mxu0 %vm213_vm0, %v180_v19 }
  0x28   : > { %1082 = vmatprep.mubr.msk.f32.mxu1 %vm213_vm0, %v196_v20 }
  0x2a   : > { %1059 = vmatmul.mubr.msk.f32.gmra.mrb[8].mxu0 %vm213_vm0, %v181_v21 }
  0x2b   : > { %1083 = vmatmul.mubr.msk.f32.gmra.mrb[8].mxu1 %vm213_vm0, %v197_v22  ;;  %1061 = vmatprep.mubr.msk.f32.mxu0 %vm213_vm0, %v182_v23 }
  0x2c   : > { %1085 = vmatprep.mubr.msk.f32.mxu1 %vm213_vm0, %v198_v24 }
  0x2e   : > { %1062 = vmatmul.mubr.msk.f32.gmra.mrb[10].mxu0 %vm213_vm0, %v183_v25 }
  0x2f   : > { %1086 = vmatmul.mubr.msk.f32.gmra.mrb[10].mxu1 %vm213_vm0, %v199_v26  ;;  %1064 = vmatprep.mubr.msk.f32.mxu0 %vm213_vm0, %v184_v27 }
  0x30   : > { %1088 = vmatprep.mubr.msk.f32.mxu1 %vm213_vm0, %v200_v28 }
  0x32   : > { %1065 = vmatmul.mubr.msk.f32.gmra.mrb[12].mxu0 %vm213_vm0, %v185_v29 }
  0x33   : > { %1089 = vmatmul.mubr.msk.f32.gmra.mrb[12].mxu1 %vm213_vm0, %v201_v30  ;;  %1067 = vmatprep.mubr.msk.f32.mxu0 %vm213_vm0, %v186_v31 }
  0x34   : > { %1091 = vmatprep.mubr.msk.f32.mxu1 %vm213_vm0, %v202_v32 }
  0x36   : > { %1068 = vmatmul.mubr.msk.f32.gmra.mrb[14].mxu0 %vm213_vm0, %v187_v33 }
  0x37   : > { %1092 = vmatmul.mubr.msk.f32.gmra.mrb[14].mxu1 %vm213_vm0, %v203_v34 }
  0xed   : > { %v1048_v36 = vpop.f32.mrb[0].mxu0 }
  0xee   : > { %v1072_v37 = vpop.f32.mrb[0].mxu1  ;;  %v382_v38 = vadd.f32 %v1048_v36, %v1355_v35  ;;  %v376_v40 = vpop.f32.mrb[1].mxu0 }
  0xef   : > { %v462_v39 = vadd.f32 %v1072_v37, %v1355_v35  ;;  %v456_v41 = vpop.f32.mrb[1].mxu1  ;;  %v377_v42 = vadd.f32 %v1355_v35, %v376_v40 }
  0xf0   : > { %v457_v43 = vadd.f32 %v1355_v35, %v456_v41  ;;  %v536_v44 = vmax.f32 %v382_v38, 0.0 }
  0xf1   : > { %v552_v45 = vmax.f32 %v462_v39, 0.0  ;;  %v535_v46 = vmax.f32 %v377_v42, 0.0  ;;  %v1051_v48 = vpop.f32.mrb[2].mxu0 }
  0xf2   : > { %v551_v47 = vmax.f32 %v457_v43, 0.0  ;;  %v1075_v49 = vpop.f32.mrb[2].mxu1  ;;  %v392_v50 = vadd.f32 %v1051_v48, %v1355_v35  ;;  %v386_v52 = vpop.f32.mrb[3].mxu0 }
  0xf3   : > { %v472_v51 = vadd.f32 %v1075_v49, %v1355_v35  ;;  %v466_v53 = vpop.f32.mrb[3].mxu1  ;;  %v916_v54 = vpack.c.bf16 %v536_v44, %v535_v46  ;;  %v387_v56 = vadd.f32 %v1355_v35, %v386_v52 }
  0xf4   : > { %v956_v55 = vpack.c.bf16 %v552_v45, %v551_v47  ;;  %v467_v57 = vadd.f32 %v1355_v35, %v466_v53  ;;  %v538_v58 = vmax.f32 %v392_v50, 0.0 }
  0xf5   : > { %v554_v59 = vmax.f32 %v472_v51, 0.0  ;;  %917 = vst [vmem:[%s1368_s10] sm:$0xff] %v916_v54   ;;  %v537_v60 = vmax.f32 %v387_v56, 0.0  ;;  %v1054_v62 = vpop.f32.mrb[4].mxu0 }
  0xf6   : > { %1000 = vst [vmem:[%s1368_s10 + $0x40] sm:$0xff] %v956_v55   ;;  %v553_v61 = vmax.f32 %v467_v57, 0.0  ;;  %v1078_v63 = vpop.f32.mrb[4].mxu1  ;;  %v402_v0 = vadd.f32 %v1054_v62, %v1355_v35  ;;  %v396_v2 = vpop.f32.mrb[5].mxu0 }
  0xf7   : > { %v482_v1 = vadd.f32 %v1078_v63, %v1355_v35  ;;  %v476_v3 = vpop.f32.mrb[5].mxu1  ;;  %v921_v4 = vpack.c.bf16 %v538_v58, %v537_v60  ;;  %v397_v6 = vadd.f32 %v1355_v35, %v396_v2 }
  0xf8   : > { %v961_v5 = vpack.c.bf16 %v554_v59, %v553_v61  ;;  %v477_v7 = vadd.f32 %v1355_v35, %v476_v3  ;;  %v540_v8 = vmax.f32 %v402_v0, 0.0 }
  0xf9   : > { %v556_v9 = vmax.f32 %v482_v1, 0.0  ;;  %993 = vst [vmem:[%s1368_s10 + $0x8] sm:$0xff] %v921_v4   ;;  %v539_v10 = vmax.f32 %v397_v6, 0.0  ;;  %v1057_v12 = vpop.f32.mrb[6].mxu0 }
  0xfa   : > { %1001 = vst [vmem:[%s1368_s10 + $0x48] sm:$0xff] %v961_v5   ;;  %v555_v11 = vmax.f32 %v477_v7, 0.0  ;;  %v1081_v13 = vpop.f32.mrb[6].mxu1  ;;  %v412_v14 = vadd.f32 %v1057_v12, %v1355_v35  ;;  %v406_v16 = vpop.f32.mrb[7].mxu0 }
  0xfb   : > { %v492_v15 = vadd.f32 %v1081_v13, %v1355_v35  ;;  %v486_v17 = vpop.f32.mrb[7].mxu1  ;;  %v926_v18 = vpack.c.bf16 %v540_v8, %v539_v10  ;;  %v407_v20 = vadd.f32 %v1355_v35, %v406_v16 }
  0xfc   : > { %v966_v19 = vpack.c.bf16 %v556_v9, %v555_v11  ;;  %v487_v21 = vadd.f32 %v1355_v35, %v486_v17  ;;  %v542_v22 = vmax.f32 %v412_v14, 0.0 }
  0xfd   : > { %v558_v23 = vmax.f32 %v492_v15, 0.0  ;;  %994 = vst [vmem:[%s1368_s10 + $0x10] sm:$0xff] %v926_v18   ;;  %v541_v24 = vmax.f32 %v407_v20, 0.0  ;;  %v1060_v26 = vpop.f32.mrb[8].mxu0 }
  0xfe   : > { %1002 = vst [vmem:[%s1368_s10 + $0x50] sm:$0xff] %v966_v19   ;;  %v557_v25 = vmax.f32 %v487_v21, 0.0  ;;  %v1084_v27 = vpop.f32.mrb[8].mxu1  ;;  %v422_v28 = vadd.f32 %v1060_v26, %v1355_v35  ;;  %v416_v30 = vpop.f32.mrb[9].mxu0 }
  0xff   : > { %v502_v29 = vadd.f32 %v1084_v27, %v1355_v35  ;;  %v496_v31 = vpop.f32.mrb[9].mxu1  ;;  %v931_v32 = vpack.c.bf16 %v542_v22, %v541_v24  ;;  %v417_v34 = vadd.f32 %v1355_v35, %v416_v30 }
 0x100   : > { %v971_v33 = vpack.c.bf16 %v558_v23, %v557_v25  ;;  %v497_v36 = vadd.f32 %v1355_v35, %v496_v31  ;;  %v544_v37 = vmax.f32 %v422_v28, 0.0 }
 0x101   : > { %v560_v38 = vmax.f32 %v502_v29, 0.0  ;;  %995 = vst [vmem:[%s1368_s10 + $0x18] sm:$0xff] %v931_v32   ;;  %v543_v39 = vmax.f32 %v417_v34, 0.0  ;;  %v1063_v41 = vpop.f32.mrb[10].mxu0 }
 0x102   : > { %1003 = vst [vmem:[%s1368_s10 + $0x58] sm:$0xff] %v971_v33   ;;  %v559_v40 = vmax.f32 %v497_v36, 0.0  ;;  %v1087_v42 = vpop.f32.mrb[10].mxu1  ;;  %v432_v43 = vadd.f32 %v1063_v41, %v1355_v35  ;;  %v426_v45 = vpop.f32.mrb[11].mxu0 }
 0x103   : > { %v512_v44 = vadd.f32 %v1087_v42, %v1355_v35  ;;  %v506_v46 = vpop.f32.mrb[11].mxu1  ;;  %v936_v47 = vpack.c.bf16 %v544_v37, %v543_v39  ;;  %v427_v49 = vadd.f32 %v1355_v35, %v426_v45 }
 0x104   : > { %v976_v48 = vpack.c.bf16 %v560_v38, %v559_v40  ;;  %v507_v50 = vadd.f32 %v1355_v35, %v506_v46  ;;  %v546_v51 = vmax.f32 %v432_v43, 0.0 }
 0x105   : > { %v562_v52 = vmax.f32 %v512_v44, 0.0  ;;  %996 = vst [vmem:[%s1368_s10 + $0x20] sm:$0xff] %v936_v47   ;;  %v545_v53 = vmax.f32 %v427_v49, 0.0  ;;  %v1066_v55 = vpop.f32.mrb[12].mxu0 }
 0x106   : > { %1004 = vst [vmem:[%s1368_s10 + $0x60] sm:$0xff] %v976_v48   ;;  %v561_v54 = vmax.f32 %v507_v50, 0.0  ;;  %v1090_v56 = vpop.f32.mrb[12].mxu1  ;;  %v442_v57 = vadd.f32 %v1066_v55, %v1355_v35  ;;  %v436_v59 = vpop.f32.mrb[13].mxu0 }
 0x107   : > { %v522_v58 = vadd.f32 %v1090_v56, %v1355_v35  ;;  %v516_v60 = vpop.f32.mrb[13].mxu1  ;;  %v941_v61 = vpack.c.bf16 %v546_v51, %v545_v53  ;;  %v437_v63 = vadd.f32 %v1355_v35, %v436_v59 }
 0x108   : > { %v981_v62 = vpack.c.bf16 %v562_v52, %v561_v54  ;;  %v517_v0 = vadd.f32 %v1355_v35, %v516_v60  ;;  %v548_v1 = vmax.f32 %v442_v57, 0.0 }
 0x109   : > { %v564_v2 = vmax.f32 %v522_v58, 0.0  ;;  %997 = vst [vmem:[%s1368_s10 + $0x28] sm:$0xff] %v941_v61   ;;  %v547_v3 = vmax.f32 %v437_v63, 0.0  ;;  %v1069_v5 = vpop.f32.mrb[14].mxu0 }
 0x10a   : > { %1005 = vst [vmem:[%s1368_s10 + $0x68] sm:$0xff] %v981_v62   ;;  %v563_v4 = vmax.f32 %v517_v0, 0.0  ;;  %v1093_v6 = vpop.f32.mrb[14].mxu1  ;;  %v452_v7 = vadd.f32 %v1069_v5, %v1355_v35  ;;  %v446_v9 = vpop.f32.mrb[15].mxu0 }
 0x10b   : > { %v532_v8 = vadd.f32 %v1093_v6, %v1355_v35  ;;  %v526_v10 = vpop.f32.mrb[15].mxu1  ;;  %v946_v11 = vpack.c.bf16 %v548_v1, %v547_v3  ;;  %v447_v13 = vadd.f32 %v1355_v35, %v446_v9 }
 0x10c   : > { %v986_v12 = vpack.c.bf16 %v564_v2, %v563_v4  ;;  %v527_v14 = vadd.f32 %v1355_v35, %v526_v10  ;;  %v550_v15 = vmax.f32 %v452_v7, 0.0 }
 0x10d   : > { %v566_v16 = vmax.f32 %v532_v8, 0.0  ;;  %998 = vst [vmem:[%s1368_s10 + $0x30] sm:$0xff] %v946_v11   ;;  %v549_v17 = vmax.f32 %v447_v13, 0.0 }
 0x10e   : > { %1006 = vst [vmem:[%s1368_s10 + $0x70] sm:$0xff] %v986_v12   ;;  %v565_v18 = vmax.f32 %v527_v14, 0.0 }
 0x10f   : > { %v951_v35 = vpack.c.bf16 %v550_v15, %v549_v17 }
 0x110   : > { %v991_v19 = vpack.c.bf16 %v566_v16, %v565_v18 }
 0x111   : > { %999 = vst [vmem:[%s1368_s10 + $0x38] sm:$0xff] %v951_v35  }
 0x112   : > { %1007 = vst [vmem:[%s1368_s10 + $0x78] sm:$0xff] %v991_v19  }
 0x113   : > { %1154 = shalt.err (!%p1151_p3)
}
 0x114   : > { %s1155_s29 = scalar_lea.hbm %s1413_s24, 2048  ;;  %s1159_s5 = scalar_lea.hbm %s1465_s3, 4096 }
 0x115   : > { %p1156_p4 = scmp.ne.s32.totalorder %s1413_s24, %s1155_s29  ;;  %p1160_p9 = scmp.lt.u32.totalorder %s1413_s24, %s1465_s3 }
 0x116   : > { %p1161_p10 = scmp.lt.u32.totalorder %s1159_s5, %s1155_s29  ;;  %p1163_p12 = scmp.lt.u32.totalorder %s1155_s29, %s1413_s24 }
 0x117   : > { %p1157_p7 = pnand %p1156_p4, %p1266_p5 }
 0x118   : > { %p1162_p11 = por %p1161_p10, %p1160_p9 }
 0x119   : > { %p1158_p8 = pneg %p1157_p7 }
 0x11a   : > { %p1164_p13 = por %p1163_p12, %p1162_p11 }
 0x11c   : > { %p1165_p0 = pnand %p1164_p13, %p1158_p8 }
 0x11e   : > { %1168 = shalt.err (!%p1165_p0)
}
 0x11f   : > { %s1206_s8 = smov 64   ;;  %s1207_s9 = smov 4  }
 0x120   : > { %1100 = dma.vmem_to_hbm [thread:$0]  (%p1266_p5), %s1415_s17, 2048, %s1413_s24, %s1421_s16, %s1206_s8, %s1206_s8, %s1207_s9  }
 0x121 PF: > { %p1106_p1 = scmp.ge.s32.totalorder %s1203_s15, 2  ;;  %s756_s10 = sand.u32 1, %s1191_s12  }
 0x122   : > { %s757_s11 = scalar_lea.sflag [#allocation3], %s756_s10 }
 0x123   : > { %p1103_p2 = pnand %p1106_p1, %p1270_p6 }
 0x125   : > { %1186 = dma.done.wait (!%p1103_p2), %s757_s11, 2048  }
 0x126   : > { %1188 = vsyncadd (!%p1103_p2), %s757_s11, 4294965248  ;;  %p13_p3 = scmp.ge.s32.totalorder %s1253_s18, 4   ;;  %s1468_s12 = smov %s1195_s13 }
 0x127   : > { %s1469_s13 = smov %s1199_s14  ;;  %s1470_s14 = smov %s1264_s21 }
 0x128   : > { %s1471_s15 = smov %s1253_s18  ;;  %15 = sbr.rel (!%p13_p3) target bundleno = 3 (0x3), region = 67 }
 0x12f   :  { %762 = vsyncpa [#allocation3], 1 }
 0x130   :  { %764 = vsyncpa [#allocation3 + $0x1], 1 }

</bundles_post_ra>
